<compile_context>
chip_gen: v7x
topology: tpu7x:2x2x1
jax: 0.10.0
libtpu: 0.0.40
codegen_flags: <defaults>
</compile_context>

<pallas_src>
import functools
import numpy as np

import jax
import jax.numpy as jnp
from jax import lax
from jax.experimental import pallas as pl
from jax.experimental.pallas import tpu as pltpu

# RegularizedFMNet / SURFMNetLoss constants (defaults of the reference implementations).
LAMBDA = 100.0
RESOLVANT_GAMMA = 0.5
W_BIJ, W_ORTH, W_LAP = 1.0, 1.0, 1e-3


# --------------------------------------------------------------------------------------
# Generation-aware VMEM budgeting / slab picking.
# --------------------------------------------------------------------------------------
def _vmem_capacity_bytes():
    try:
        return int(pltpu.get_tpu_info().vmem_capacity_bytes)
    except Exception:
        return 64 * 1024 * 1024  # conservative (v7x per-TC) fallback


def _pick_slab_loss(n, k, l2, budget):
    """Row-slab size for Pxy/Pyx in the loss kernel (f32 blocks, double-buffered)."""
    resident = 2 * (2 * k * n * 4 + l2 * n * 4 + 2 * k * k * 4 + 4 * k * 4)
    scratch = 2 * k * n * 4 + l2 * n * 2
    for slab in (1024, 512, 256, 128):
        if n % slab:
            continue
        per_step = 2 * (2 * slab * n * 4 + l2 * slab * 4)
        if resident + scratch + per_step <= budget:
            return slab
    # TODO(synk): for extreme N even slab=128 of f32 P may exceed the budget; that would
    # need an additional column (N) tiling of the P blocks.
    return 128


def _pick_slab_setup(n, k, c, l2, budget):
    """Vertex-slab size for the setup kernel."""
    resident = 2 * (c * (l2 // 2) * 4 + 4 * k * k * 4)
    scratch = 2 * k * c * 4
    for slab in (2048, 1024, 512, 256, 128):
        if n % slab:
            continue
        per_step = 2 * (2 * slab * c * 4 + 2 * k * slab * 4 + l2 * slab * 4)
        if resident + scratch + per_step <= budget:
            return slab
    return 128


# --------------------------------------------------------------------------------------
# Kernel 1: spectral projections (accumulated over N slabs) + one stacked Gram +
#           lane-dense SW feature projections.
# --------------------------------------------------------------------------------------
def _fm_setup_kernel(fx_ref, fy_ref, xv_ref, yv_ref, th_ref, g_ref, pp_ref, ab_acc):
    s = pl.program_id(1)
    ns = pl.num_programs(1)
    K = xv_ref.shape[0]

    @pl.when(s == 0)
    def _():
        ab_acc[...] = jnp.zeros_like(ab_acc)

    fx = fx_ref[...]                                                        # (slab, C)
    fy = fy_ref[...]
    # A += Phi_x^T[:, slab] f_x[slab], B += Phi_y^T[:, slab] f_y[slab]   (K should be a
    # multiple of 8 for aligned sublane stores; true for typical spectral basis sizes).
    ab_acc[:K, :] += jnp.dot(xv_ref[...], fx, preferred_element_type=jnp.float32)
    ab_acc[K:, :] += jnp.dot(yv_ref[...], fy, preferred_element_type=jnp.float32)

    th = th_ref[...]                                                        # (C, L)
    L = th.shape[1]
    # lane-dense (L, slab) tiles of (f θ)^T : contract over C so the last dim stays slab.
    pp_ref[:L, :] = lax.dot_general(th, fx, (((0,), (1,)), ((), ())),
                                    preferred_element_type=jnp.float32)
    pp_ref[L:, :] = lax.dot_general(th, fy, (((0,), (1,)), ((), ())),
                                    preferred_element_type=jnp.float32)

    @pl.when(s == ns - 1)
    def _():
        ab = ab_acc[...]                                                    # (2K, C)
        # G = [[A A^T, A B^T], [B A^T, B B^T]] in a single MXU push.
        g_ref[...] = lax.dot_general(ab, ab, (((1,), (1,)), ((), ())),
                                     preferred_element_type=jnp.float32)


def fm_setup(feat_x, feat_y, x_vecs, y_vecs, theta, slab, vmem_limit):
    B, N, C = feat_x.shape
    K = x_vecs.shape[1]
    L = theta.shape[1]
    S = N // slab
    out_g = jax.ShapeDtypeStruct((B, 2 * K, 2 * K), jnp.float32)
    out_pp = jax.ShapeDtypeStruct((B, 2 * L, N), jnp.float32)
    return pl.pallas_call(
        _fm_setup_kernel,
        out_shape=(out_g, out_pp),
        grid_spec=pltpu.PrefetchScalarGridSpec(
            num_scalar_prefetch=0,
            grid=(B, S),
            in_specs=[
                pl.BlockSpec((None, slab, C), lambda b, s: (b, s, 0)),
                pl.BlockSpec((None, slab, C), lambda b, s: (b, s, 0)),
                pl.BlockSpec((None, K, slab), lambda b, s: (b, 0, s)),
                pl.BlockSpec((None, K, slab), lambda b, s: (b, 0, s)),
                pl.BlockSpec((C, L), lambda b, s: (0, 0)),
            ],
            out_specs=(
                pl.BlockSpec((None, 2 * K, 2 * K), lambda b, s: (b, 0, 0)),
                pl.BlockSpec((None, 2 * L, slab), lambda b, s: (b, 0, s)),
            ),
            scratch_shapes=[pltpu.VMEM((2 * K, C), jnp.float32)],
        ),
        compiler_params=pltpu.CompilerParams(
            dimension_semantics=("parallel", "arbitrary"),
            vmem_limit_bytes=vmem_limit),
    )(feat_x, feat_y, x_vecs, y_vecs, theta)


# --------------------------------------------------------------------------------------
# Kernel 2: per batch b and row-slab s of Pxy/Pyx (f32 in HBM, bf16 in-kernel):
#   - accumulate (Phi_y^T M @ Pyx) and (Phi_x^T M @ Pxy) into (K, N) scratch
#   - emit lane-dense P @ (f θ) projection tiles for this slab
#   - at the last slab, do the single KxK contraction with the eigenbases and emit all
#     four loss scalars as one (1, 8) tile.
# --------------------------------------------------------------------------------------
def _loss_kernel(cxy_ref, cyx_ref,
                 evx_r_ref, evy_r_ref, evx_c_ref, evy_c_ref,
                 xv_ref, yv_ref, pxy_ref, pyx_ref, pp_ref,
                 scal_ref, proj_ref,
                 t1_acc, t2_acc, pp_bf):
    s = pl.program_id(1)
    ns = pl.num_programs(1)
    slab = pxy_ref.shape[0]
    L = pp_bf.shape[0] // 2

    @pl.when(s == 0)
    def _():
        t1_acc[...] = jnp.zeros_like(t1_acc)
        t2_acc[...] = jnp.zeros_like(t2_acc)
        pp_bf[...] = pp_ref[...].astype(jnp.bfloat16)   # cast pp once per batch

    # f32 P row-slabs straight from HBM; bf16 cast stays inside the kernel (no extra
    # HBM pass over the largest tensors).
    pxy = pxy_ref[...].astype(jnp.bfloat16)              # (slab, N)
    pyx = pyx_ref[...].astype(jnp.bfloat16)

    # 128-aligned in-kernel column-slab views of the resident eigenbases (no duplicate
    # HBM streams for the column slabs).
    col = pl.multiple_of(s * slab, 128)
    xvs = xv_ref[:, pl.ds(col, slab)].astype(jnp.bfloat16)   # (K, slab)
    yvs = yv_ref[:, pl.ds(col, slab)].astype(jnp.bfloat16)

    # (Phi^T M) @ P accumulated as (K, N); KxK contraction hoisted to the last slab.
    t1_acc[...] += jnp.dot(yvs, pyx, preferred_element_type=jnp.float32)   # Phi_y^T M Pyx
    t2_acc[...] += jnp.dot(xvs, pxy, preferred_element_type=jnp.float32)   # Phi_x^T M Pxy

    # Lane-dense sliced-Wasserstein projections of P-aligned features:
    # (P @ (f θ))^T tiles of shape (L, slab) (contraction over N).
    proj_ref[:L, :] = lax.dot_general(pp_bf[L:, :], pxy, (((1,), (1,)), ((), ())),
                                      preferred_element_type=jnp.float32)  # Pxy (f_y θ)
    proj_ref[L:, :] = lax.dot_general(pp_bf[:L, :], pyx, (((1,), (1,)), ((), ())),
                                      preferred_element_type=jnp.float32)  # Pyx (f_x θ)

    @pl.when(s == ns - 1)
    def _():
        cxy_est = lax.dot_general(t1_acc[...], xv_ref[...], (((1,), (1,)), ((), ())),
                                  preferred_element_type=jnp.float32)      # (K, K)
        cyx_est = lax.dot_general(t2_acc[...], yv_ref[...], (((1,), (1,)), ((), ())),
                                  preferred_element_type=jnp.float32)
        cxy = cxy_ref[...]
        cyx = cyx_ref[...]
        K = cxy.shape[0]
        eye = jnp.eye(K, dtype=jnp.float32)

        def fro(m):  # squared Frobenius norm as a (1, 1) tile (no rank-0 values)
            return jnp.sum(m * m, axis=(0, 1), keepdims=True)

        bij = (fro(jnp.dot(cxy, cyx, preferred_element_type=jnp.float32) - eye) +
               fro(jnp.dot(cyx, cxy, preferred_element_type=jnp.float32) - eye))
        orth = (fro(jnp.dot(cxy.T, cxy, preferred_element_type=jnp.float32) - eye) +
                fro(jnp.dot(cyx.T, cyx, preferred_element_type=jnp.float32) - eye))
        lap = (fro(cxy * evx_r_ref[...] - evy_c_ref[...] * cxy) +
               fro(cyx * evy_r_ref[...] - evx_c_ref[...] * cyx))
        align = fro(cxy - cxy_est) + fro(cyx - cyx_est)

        lane = lax.broadcasted_iota(jnp.int32, (1, 8), 1)
        m0 = (lane == 0).astype(jnp.float32)
        m1 = (lane == 1).astype(jnp.float32)
        m2 = (lane == 2).astype(jnp.float32)
        m3 = (lane == 3).astype(jnp.float32)
        scal_ref[...] = bij * m0 + orth * m1 + lap * m2 + align * m3


def loss_kernel_call(Cxy, Cyx, evals_x, evals_y, x_vecs, y_vecs, Pxy, Pyx, pp,
                     slab, vmem_limit):
    B, K, _ = Cxy.shape
    N = x_vecs.shape[2]
    L2 = pp.shape[1]
    S = N // slab

    evx_r = evals_x[:, None, :]
    evy_r = evals_y[:, None, :]
    evx_c = evals_x[:, :, None]
    evy_c = evals_y[:, :, None]

    scal_shape = jax.ShapeDtypeStruct((B, 1, 8), jnp.float32)
    proj_shape = jax.ShapeDtypeStruct((B, L2, N), jnp.float32)

    def b_res(shape):  # per-batch block, resident across the slab axis
        return pl.BlockSpec((None,) + shape, lambda b, s: (b, 0, 0))

    in_specs = [
        b_res((K, K)), b_res((K, K)),                             # Cxy, Cyx
        b_res((1, K)), b_res((1, K)),                             # evals rows
        b_res((K, 1)), b_res((K, 1)),                             # evals cols
        b_res((K, N)), b_res((K, N)),                             # x_vecs, y_vecs (full)
        pl.BlockSpec((None, slab, N), lambda b, s: (b, s, 0)),    # Pxy row slab (f32)
        pl.BlockSpec((None, slab, N), lambda b, s: (b, s, 0)),    # Pyx row slab (f32)
        b_res((L2, N)),                                           # packed [(fxθ)^T;(fyθ)^T]
    ]
    out_specs = (
        pl.BlockSpec((None, 1, 8), lambda b, s: (b, 0, 0)),       # packed scalars
        pl.BlockSpec((None, L2, slab), lambda b, s: (b, 0, s)),   # lane-dense projections
    )

    return pl.pallas_call(
        _loss_kernel,
        out_shape=(scal_shape, proj_shape),
        grid_spec=pltpu.PrefetchScalarGridSpec(
            num_scalar_prefetch=0,
            grid=(B, S),
            in_specs=in_specs,
            out_specs=out_specs,
            scratch_shapes=[pltpu.VMEM((K, N), jnp.float32),
                            pltpu.VMEM((K, N), jnp.float32),
                            pltpu.VMEM((L2, N), jnp.bfloat16)],
        ),
        compiler_params=pltpu.CompilerParams(
            dimension_semantics=("parallel", "arbitrary"),
            vmem_limit_bytes=vmem_limit),
    )(Cxy, Cyx, evx_r, evy_r, evx_c, evy_c, x_vecs, y_vecs, Pxy, Pyx, pp)


# --------------------------------------------------------------------------------------
# JAX glue: resolvent mask + the K x K regularized solves of RegularizedFMNet.
# --------------------------------------------------------------------------------------
def get_mask(evals1, evals2, gamma):
    scale = jnp.maximum(jnp.max(evals1, axis=1), jnp.max(evals2, axis=1))[:, None]
    e1 = evals1 / scale
    e2 = evals2 / scale
    g1 = (e1 ** gamma)[:, None, :]   # [B, 1, K]
    g2 = (e2 ** gamma)[:, :, None]   # [B, K, 1]
    m_re = g2 / (g2 * g2 + 1.0) - g1 / (g1 * g1 + 1.0)
    m_im = 1.0 / (g2 * g2 + 1.0) - 1.0 / (g1 * g1 + 1.0)
    return m_re * m_re + m_im * m_im  # [B, K, K]


def solve_fmap(AAt, BAt, D, lam=LAMBDA):
    # TODO(synk): the K x K regularized solves use jnp.linalg.solve — Pallas has no linear
    # solver primitive; all N-sized matmuls feeding them run inside the Pallas kernels.
    K = AAt.shape[1]
    eye = jnp.eye(K, dtype=AAt.dtype)
    M = AAt[:, None, :, :] + lam * (D[:, :, :, None] * eye)   # [B, K, K, K]
    rhs = BAt[:, :, :, None]                                  # [B, K, K, 1]
    return jnp.linalg.solve(M, rhs)[..., 0]


# --------------------------------------------------------------------------------------
# Full forward (mirrors proj_loss_sparse_oncefmap.forward)
# --------------------------------------------------------------------------------------
def proj_loss_sparse_oncefmap_forward(feat_x, feat_y, x_vals, y_vals, x_vecs, y_vecs,
                                      Pxy, Pyx, theta, w_ot):
    feat_x = feat_x.astype(jnp.float32)
    feat_y = feat_y.astype(jnp.float32)
    x_vals = x_vals.astype(jnp.float32)
    y_vals = y_vals.astype(jnp.float32)

    B, N, C = feat_x.shape
    K = x_vecs.shape[1]
    L = theta.shape[1]

    # Zero-pad the vertex dim to a multiple of 128 so every slab is (8,128)-friendly.
    # Padded rows/cols are mathematically inert (zero contributions everywhere); the only
    # place they could leak is the SW sort, so pp/proj are sliced back to N below.
    Np = -(-N // 128) * 128
    if Np != N:
        p = Np - N
        feat_x = jnp.pad(feat_x, ((0, 0), (0, p), (0, 0)))
        feat_y = jnp.pad(feat_y, ((0, 0), (0, p), (0, 0)))
        x_vecs = jnp.pad(x_vecs, ((0, 0), (0, 0), (0, p)))
        y_vecs = jnp.pad(y_vecs, ((0, 0), (0, 0), (0, p)))
        Pxy = jnp.pad(Pxy, ((0, 0), (0, p), (0, p)))
        Pyx = jnp.pad(Pyx, ((0, 0), (0, p), (0, p)))

    # Generation-aware VMEM budgeting (v5e/v6e: 128 MiB, v7x: 64 MiB per TC).
    cap = _vmem_capacity_bytes()
    vmem_limit = max(32 << 20, min(int(cap * 0.9), cap - (4 << 20)))
    slab_budget = int(cap * 0.7)

    # RegularizedFMNet (bidirectional): one fused setup kernel, tiny solves in JAX.
    slab1 = _pick_slab_setup(Np, K, C, 2 * L, slab_budget)
    G, pp = fm_setup(feat_x, feat_y, x_vecs, y_vecs, theta, slab1, vmem_limit)
    AAt = G[:, :K, :K]
    ABt = G[:, :K, K:]
    BAt = G[:, K:, :K]
    BBt = G[:, K:, K:]
    Cxy = solve_fmap(AAt, BAt, get_mask(x_vals, y_vals, RESOLVANT_GAMMA))
    Cyx = solve_fmap(BBt, ABt, get_mask(y_vals, x_vals, RESOLVANT_GAMMA))

    # TODO(synk): when B == 1 on v7x the single "parallel" batch axis leaves one TensorCore
    # idle; a core-split of the slab axis (partial Cxy_est summed in JAX) would fix that.
    slab2 = _pick_slab_loss(Np, K, 2 * L, slab_budget)
    scal, proj = loss_kernel_call(Cxy, Cyx, x_vals, y_vals, x_vecs, y_vecs,
                                  Pxy, Pyx, pp, slab2, vmem_limit)

    bij = scal[:, 0, 0]
    orth = scal[:, 0, 1]
    lap = scal[:, 0, 2]
    align = scal[:, 0, 3]

    loss_dict = {}
    loss_dict['l_lap'] = W_LAP * jnp.mean(lap)
    loss_dict['l_orth'] = W_ORTH * jnp.mean(orth)
    loss_dict['l_bij'] = W_BIJ * jnp.mean(bij)
    loss_dict['l_align'] = jnp.mean(align)

    # pp / proj are stored lane-dense as (B, 2L, N); sort over the vertex axis (last).
    px = pp[:, :L, :N]
    py = pp[:, L:, :N]
    pxy_p = proj[:, :L, :N]
    pyx_p = proj[:, L:, :N]
    # TODO(synk): SW (sliced-Wasserstein) reference implementation not provided; this is a
    # deterministic sliced-Wasserstein between each feature set and its P-aligned counterpart
    # (projections computed in the Pallas kernels, sorting done in JAX — no Pallas sort).
    sw = (jnp.mean((jnp.sort(px, axis=2) - jnp.sort(pxy_p, axis=2)) ** 2) +
          jnp.mean((jnp.sort(py, axis=2) - jnp.sort(pyx_p, axis=2)) ** 2))
    loss_dict['l_ot'] = w_ot * sw
    return loss_dict


# --------------------------------------------------------------------------------------
# Pure-JAX reference (same math, f32 everywhere) used as a silent self-check.
# --------------------------------------------------------------------------------------
def _ref_forward(feat_x, feat_y, x_vals, y_vals, x_vecs, y_vecs, Pxy, Pyx, theta, w_ot):
    feat_x = feat_x.astype(jnp.float32)
    feat_y = feat_y.astype(jnp.float32)
    A = jnp.einsum('bkn,bnc->bkc', x_vecs, feat_x)
    Bm = jnp.einsum('bkn,bnc->bkc', y_vecs, feat_y)
    AAt = jnp.einsum('bkc,blc->bkl', A, A)
    BAt = jnp.einsum('bkc,blc->bkl', Bm, A)
    BBt = jnp.einsum('bkc,blc->bkl', Bm, Bm)
    ABt = jnp.einsum('bkc,blc->bkl', A, Bm)
    Cxy = solve_fmap(AAt, BAt, get_mask(x_vals, y_vals, RESOLVANT_GAMMA))
    Cyx = solve_fmap(BBt, ABt, get_mask(y_vals, x_vals, RESOLVANT_GAMMA))
    K = Cxy.shape[1]
    eye = jnp.eye(K, dtype=jnp.float32)

    def sqfro(a, b):
        return jnp.mean(jnp.sum((a - b) ** 2, axis=(1, 2)))

    d = {}
    d['l_lap'] = W_LAP * (sqfro(Cxy * x_vals[:, None, :], y_vals[:, :, None] * Cxy) +
                          sqfro(Cyx * y_vals[:, None, :], x_vals[:, :, None] * Cyx))
    d['l_orth'] = W_ORTH * (sqfro(jnp.einsum('bji,bjk->bik', Cxy, Cxy), eye) +
                            sqfro(jnp.einsum('bji,bjk->bik', Cyx, Cyx), eye))
    d['l_bij'] = W_BIJ * (sqfro(jnp.einsum('bij,bjk->bik', Cxy, Cyx), eye) +
                          sqfro(jnp.einsum('bij,bjk->bik', Cyx, Cxy), eye))
    xt = jnp.swapaxes(x_vecs, 2, 1)
    yt = jnp.swapaxes(y_vecs, 2, 1)
    Cxy_est = jnp.einsum('bkn,bnl->bkl', y_vecs, jnp.einsum('bnm,bml->bnl', Pyx, xt))
    Cyx_est = jnp.einsum('bkn,bnl->bkl', x_vecs, jnp.einsum('bnm,bml->bnl', Pxy, yt))
    d['l_align'] = sqfro(Cxy, Cxy_est) + sqfro(Cyx, Cyx_est)
    px = jnp.einsum('bnc,cl->bnl', feat_x, theta)
    py = jnp.einsum('bnc,cl->bnl', feat_y, theta)
    pxy = jnp.einsum('bnc,cl->bnl', jnp.einsum('bnm,bmc->bnc', Pxy, feat_y), theta)
    pyx = jnp.einsum('bnc,cl->bnl', jnp.einsum('bnm,bmc->bnc', Pyx, feat_x), theta)
    sw = (jnp.mean((jnp.sort(px, axis=1) - jnp.sort(pxy, axis=1)) ** 2) +
          jnp.mean((jnp.sort(py, axis=1) - jnp.sort(pyx, axis=1)) ** 2))
    d['l_ot'] = w_ot * sw
    return d


if __name__ == "__main__":
    # Small, FM-style shapes: B shape pairs, N vertices, K spectral basis, C feature dims.
    B, N, K, C = 2, 128, 16, 32
    W_OT, L_OT = 1.0, 16          # cfg.loss.w_ot, cfg.loss.L_ot

    key = jax.random.PRNGKey(0)
    ks = jax.random.split(key, 9)
    feat_x = jax.random.normal(ks[0], (B, N, C), jnp.float32)
    feat_y = jax.random.normal(ks[1], (B, N, C), jnp.float32)
    x_vals = jnp.cumsum(jnp.abs(jax.random.normal(ks[2], (B, K))), axis=1).astype(jnp.float32)
    y_vals = jnp.cumsum(jnp.abs(jax.random.normal(ks[3], (B, K))), axis=1).astype(jnp.float32)
    x_vecs = jax.random.normal(ks[4], (B, K, N), jnp.float32) / np.sqrt(N)
    y_vecs = jax.random.normal(ks[5], (B, K, N), jnp.float32) / np.sqrt(N)
    Pxy = jax.nn.softmax(jax.random.normal(ks[6], (B, N, N), jnp.float32), axis=-1)
    Pyx = jax.nn.softmax(jax.random.normal(ks[7], (B, N, N), jnp.float32), axis=-1)
    # deterministic SW projection directions (the only "parameter"-like tensor in the module)
    theta = jax.random.normal(ks[8], (C, L_OT), jnp.float32)
    theta = theta / jnp.linalg.norm(theta, axis=0, keepdims=True)

    fwd = functools.partial(proj_loss_sparse_oncefmap_forward, w_ot=W_OT)
    out = fwd(feat_x, feat_y, x_vals, y_vals, x_vecs, y_vecs, Pxy, Pyx, theta)
    out = jax.tree_util.tree_map(jax.block_until_ready, out)

    ref = _ref_forward(feat_x, feat_y, x_vals, y_vals, x_vecs, y_vecs, Pxy, Pyx, theta, W_OT)
    for name in ('l_lap', 'l_orth', 'l_bij', 'l_align', 'l_ot'):
        v = np.asarray(out[name])
        assert np.all(np.isfinite(v))
        np.testing.assert_allclose(v, np.asarray(ref[name]), rtol=1e-1, atol=1e-5)

    print("KERNEL_OK")
</pallas_src>

<mosaic_0001>
module attributes {stable_mosaic.version = 11 : i64} {
  func.func @_fm_setup_kernel(%arg0: i32, %arg1: i32, %arg2: memref<1x128x32xf32, #tpu.memory_space<vmem>>, %arg3: memref<1x128x32xf32, #tpu.memory_space<vmem>>, %arg4: memref<1x16x128xf32, #tpu.memory_space<vmem>>, %arg5: memref<1x16x128xf32, #tpu.memory_space<vmem>>, %arg6: memref<32x16xf32, #tpu.memory_space<vmem>>, %arg7: memref<1x32x32xf32, #tpu.memory_space<vmem>>, %arg8: memref<1x32x128xf32, #tpu.memory_space<vmem>>, %arg9: memref<32x32xf32, #tpu.memory_space<vmem>>) attributes {dimension_semantics = [#tpu.dimension_semantics<parallel>, #tpu.dimension_semantics<arbitrary>], iteration_bounds = array<i64: 2, 1>, scalar_prefetch = 0 : i64, scratch_operands = 1 : i64, tpu.core_type = #tpu.core_type<tc>, window_params = [{transform_indices = @transform_0, window_bounds = array<i64: 1, 128, 32>}, {transform_indices = @transform_1, window_bounds = array<i64: 1, 128, 32>}, {transform_indices = @transform_2, window_bounds = array<i64: 1, 16, 128>}, {transform_indices = @transform_3, window_bounds = array<i64: 1, 16, 128>}, {pipeline_mode = #tpu.pipeline_mode<synchronous>, transform_indices = @transform_4, window_bounds = array<i64: 32, 16>}, {transform_indices = @transform_5, window_bounds = array<i64: 1, 32, 32>}, {transform_indices = @transform_6, window_bounds = array<i64: 1, 32, 128>}]} {
    %c0_i32 = arith.constant 0 : i32
    %0 = arith.cmpi eq, %arg1, %c0_i32 : i32
    %1 = arith.extui %0 : i1 to i32
    %c0_i32_0 = arith.constant 0 : i32
    %2 = arith.cmpi ne, %1, %c0_i32_0 : i32
    scf.if %2 {
      %cst_32 = arith.constant 0.000000e+00 : f32
      %31 = vector.broadcast %cst_32 : f32 to vector<32x32xf32>
      %c0_33 = arith.constant 0 : index
      %c0_34 = arith.constant 0 : index
      %32 = vector.load %arg9[%c0_33, %c0_34] : memref<32x32xf32, #tpu.memory_space<vmem>>, vector<32x32xf32>
      tpu.vector_store %arg9[%c0_33, %c0_34], %31 {strides = array<i32>} : memref<32x32xf32, #tpu.memory_space<vmem>>, vector<32x32xf32>,
    } else {
    }
    %c0 = arith.constant 0 : index
    %c0_1 = arith.constant 0 : index
    %c0_2 = arith.constant 0 : index
    %3 = vector.load %arg2[%c0, %c0_1, %c0_2] : memref<1x128x32xf32, #tpu.memory_space<vmem>>, vector<1x128x32xf32>
    %4 = vector.shape_cast %3 : vector<1x128x32xf32> to vector<128x32xf32>
    %c0_3 = arith.constant 0 : index
    %c0_4 = arith.constant 0 : index
    %c0_5 = arith.constant 0 : index
    %5 = vector.load %arg3[%c0_3, %c0_4, %c0_5] : memref<1x128x32xf32, #tpu.memory_space<vmem>>, vector<1x128x32xf32>
    %6 = vector.shape_cast %5 : vector<1x128x32xf32> to vector<128x32xf32>
    %c0_6 = arith.constant 0 : index
    %c0_7 = arith.constant 0 : index
    %7 = vector.load %arg9[%c0_6, %c0_7] : memref<32x32xf32, #tpu.memory_space<vmem>>, vector<16x32xf32>
    %c0_8 = arith.constant 0 : index
    %c0_9 = arith.constant 0 : index
    %c0_10 = arith.constant 0 : index
    %8 = vector.load %arg4[%c0_8, %c0_9, %c0_10] : memref<1x16x128xf32, #tpu.memory_space<vmem>>, vector<1x16x128xf32>
    %9 = vector.shape_cast %8 : vector<1x16x128xf32> to vector<16x128xf32>
    %cst = arith.constant dense<0.000000e+00> : vector<16x32xf32>
    %10 = tpu.matmul %9, %4, %cst {dimension_numbers = #tpu.dot_dimension_numbers<[1], [0], [0], [1], [0, 0, 1, 1], [], []>} : vector<16x128xf32>, vector<128x32xf32>, vector<16x32xf32> -> vector<16x32xf32>
    %11 = arith.addf %7, %10 : vector<16x32xf32>
    %c0_11 = arith.constant 0 : index
    %c0_12 = arith.constant 0 : index
    %12 = vector.load %arg9[%c0_11, %c0_12] : memref<32x32xf32, #tpu.memory_space<vmem>>, vector<16x32xf32>
    tpu.vector_store %arg9[%c0_11, %c0_12], %11 {strides = array<i32>} : memref<32x32xf32, #tpu.memory_space<vmem>>, vector<16x32xf32>,
    %c16 = arith.constant 16 : index
    %c0_13 = arith.constant 0 : index
    %13 = vector.load %arg9[%c16, %c0_13] : memref<32x32xf32, #tpu.memory_space<vmem>>, vector<16x32xf32>
    %c0_14 = arith.constant 0 : index
    %c0_15 = arith.constant 0 : index
    %c0_16 = arith.constant 0 : index
    %14 = vector.load %arg5[%c0_14, %c0_15, %c0_16] : memref<1x16x128xf32, #tpu.memory_space<vmem>>, vector<1x16x128xf32>
    %15 = vector.shape_cast %14 : vector<1x16x128xf32> to vector<16x128xf32>
    %cst_17 = arith.constant dense<0.000000e+00> : vector<16x32xf32>
    %16 = tpu.matmul %15, %6, %cst_17 {dimension_numbers = #tpu.dot_dimension_numbers<[1], [0], [0], [1], [0, 0, 1, 1], [], []>} : vector<16x128xf32>, vector<128x32xf32>, vector<16x32xf32> -> vector<16x32xf32>
    %17 = arith.addf %13, %16 : vector<16x32xf32>
    %c16_18 = arith.constant 16 : index
    %c0_19 = arith.constant 0 : index
    %18 = vector.load %arg9[%c16_18, %c0_19] : memref<32x32xf32, #tpu.memory_space<vmem>>, vector<16x32xf32>
    tpu.vector_store %arg9[%c16_18, %c0_19], %17 {strides = array<i32>} : memref<32x32xf32, #tpu.memory_space<vmem>>, vector<16x32xf32>,
    %c0_20 = arith.constant 0 : index
    %c0_21 = arith.constant 0 : index
    %19 = vector.load %arg6[%c0_20, %c0_21] : memref<32x16xf32, #tpu.memory_space<vmem>>, vector<32x16xf32>
    %cst_22 = arith.constant dense<0.000000e+00> : vector<16x128xf32>
    %20 = tpu.matmul %19, %4, %cst_22 {dimension_numbers = #tpu.dot_dimension_numbers<[0], [1], [1], [0], [0, 1, 1, 0], [], []>} : vector<32x16xf32>, vector<128x32xf32>, vector<16x128xf32> -> vector<16x128xf32>
    %c0_23 = arith.constant 0 : index
    %c0_24 = arith.constant 0 : index
    %c0_25 = arith.constant 0 : index
    %21 = vector.load %arg8[%c0_23, %c0_24, %c0_25] : memref<1x32x128xf32, #tpu.memory_space<vmem>>, vector<1x16x128xf32>
    %22 = vector.shape_cast %21 : vector<1x16x128xf32> to vector<16x128xf32>
    %23 = vector.shape_cast %20 : vector<16x128xf32> to vector<1x16x128xf32>
    tpu.vector_store %arg8[%c0_23, %c0_24, %c0_25], %23 {strides = array<i32>} : memref<1x32x128xf32, #tpu.memory_space<vmem>>, vector<1x16x128xf32>,
    %cst_26 = arith.constant dense<0.000000e+00> : vector<16x128xf32>
    %24 = tpu.matmul %19, %6, %cst_26 {dimension_numbers = #tpu.dot_dimension_numbers<[0], [1], [1], [0], [0, 1, 1, 0], [], []>} : vector<32x16xf32>, vector<128x32xf32>, vector<16x128xf32> -> vector<16x128xf32>
    %c0_27 = arith.constant 0 : index
    %c16_28 = arith.constant 16 : index
    %c0_29 = arith.constant 0 : index
    %25 = vector.load %arg8[%c0_27, %c16_28, %c0_29] : memref<1x32x128xf32, #tpu.memory_space<vmem>>, vector<1x16x128xf32>
    %26 = vector.shape_cast %25 : vector<1x16x128xf32> to vector<16x128xf32>
    %27 = vector.shape_cast %24 : vector<16x128xf32> to vector<1x16x128xf32>
    tpu.vector_store %arg8[%c0_27, %c16_28, %c0_29], %27 {strides = array<i32>} : memref<1x32x128xf32, #tpu.memory_space<vmem>>, vector<1x16x128xf32>,
    %c0_i32_30 = arith.constant 0 : i32
    %28 = arith.cmpi eq, %arg1, %c0_i32_30 : i32
    %29 = arith.extui %28 : i1 to i32
    %c0_i32_31 = arith.constant 0 : i32
    %30 = arith.cmpi ne, %29, %c0_i32_31 : i32
    scf.if %30 {
      %c0_32 = arith.constant 0 : index
      %c0_33 = arith.constant 0 : index
      %31 = vector.load %arg9[%c0_32, %c0_33] : memref<32x32xf32, #tpu.memory_space<vmem>>, vector<32x32xf32>
      %cst_34 = arith.constant dense<0.000000e+00> : vector<32x32xf32>
      %32 = tpu.matmul %31, %31, %cst_34 {dimension_numbers = #tpu.dot_dimension_numbers<[1], [1], [0], [0], [0, 0, 1, 0], [], []>} : vector<32x32xf32>, vector<32x32xf32>, vector<32x32xf32> -> vector<32x32xf32>
      %c0_35 = arith.constant 0 : index
      %c0_36 = arith.constant 0 : index
      %c0_37 = arith.constant 0 : index
      %33 = vector.load %arg7[%c0_35, %c0_36, %c0_37] : memref<1x32x32xf32, #tpu.memory_space<vmem>>, vector<1x32x32xf32>
      %34 = vector.shape_cast %33 : vector<1x32x32xf32> to vector<32x32xf32>
      %35 = vector.shape_cast %32 : vector<32x32xf32> to vector<1x32x32xf32>
      tpu.vector_store %arg7[%c0_35, %c0_36, %c0_37], %35 {strides = array<i32>} : memref<1x32x32xf32, #tpu.memory_space<vmem>>, vector<1x32x32xf32>,
    } else {
    }
    return
  }
  func.func @transform_0(%arg0: i32, %arg1: i32) -> (i32, i32, i32) {
    %c0_i32 = arith.constant 0 : i32
    %c0_i32_0 = arith.constant 0 : i32
    return %arg0, %arg1, %c0_i32 : i32, i32, i32
  }
  func.func @transform_1(%arg0: i32, %arg1: i32) -> (i32, i32, i32) {
    %c0_i32 = arith.constant 0 : i32
    %c0_i32_0 = arith.constant 0 : i32
    return %arg0, %arg1, %c0_i32 : i32, i32, i32
  }
  func.func @transform_2(%arg0: i32, %arg1: i32) -> (i32, i32, i32) {
    %c0_i32 = arith.constant 0 : i32
    %c0_i32_0 = arith.constant 0 : i32
    return %arg0, %c0_i32, %arg1 : i32, i32, i32
  }
  func.func @transform_3(%arg0: i32, %arg1: i32) -> (i32, i32, i32) {
    %c0_i32 = arith.constant 0 : i32
    %c0_i32_0 = arith.constant 0 : i32
    return %arg0, %c0_i32, %arg1 : i32, i32, i32
  }
  func.func @transform_4(%arg0: i32, %arg1: i32) -> (i32, i32) {
    %c0_i32 = arith.constant 0 : i32
    %c0_i32_0 = arith.constant 0 : i32
    %c0_i32_1 = arith.constant 0 : i32
    return %c0_i32, %c0_i32_0 : i32, i32
  }
  func.func @transform_5(%arg0: i32, %arg1: i32) -> (i32, i32, i32) {
    %c0_i32 = arith.constant 0 : i32
    %c0_i32_0 = arith.constant 0 : i32
    %c0_i32_1 = arith.constant 0 : i32
    return %arg0, %c0_i32, %c0_i32_0 : i32, i32, i32
  }
  func.func @transform_6(%arg0: i32, %arg1: i32) -> (i32, i32, i32) {
    %c0_i32 = arith.constant 0 : i32
    %c0_i32_0 = arith.constant 0 : i32
    return %arg0, %c0_i32, %arg1 : i32, i32, i32
  }
}

</mosaic_0001>

<bundles_post_ra>
// kernel: tpu_custom_call.1
= control target key start
LH: loop header
LB: loop body
LE: loop exit
PB: predicated region body
PF: predicated region fallthrough
CT: control target
= control target key end

     0   :  { %12 = vsyncpa [#allocation4], 0  ;;  %s2287_s0 = inlined_call_operand.vmem [shape: f32[2,128,32], index: 0, kind: input, shape index: {}]   ;;  %s2288_s1 = inlined_call_operand.vmem [shape: f32[2,128,32], index: 1, kind: input, shape index: {}]   ;;  %s2289_s2 = inlined_call_operand.vmem [shape: f32[2,16,128], index: 2, kind: input, shape index: {}]   ;;  %s2290_s3 = inlined_call_operand.vmem [shape: f32[2,16,128], index: 3, kind: input, shape index: {}]   ;;  %s2291_s4 = inlined_call_operand.vmem [shape: f32[32,16], index: 4, kind: input, shape index: {}]   ;;  %s2292_s5 = inlined_call_operand.hbm [shape: f32[2,32,32], index: 5, kind: output, shape index: {0}]   ;;  %s2293_s6 = inlined_call_operand.hbm [shape: f32[2,32,128], index: 6, kind: output, shape index: {1}]  }
   0x1   :  { %14 = vsyncpa [#allocation4 + $0x1], 0 }
   0x2   :  { %15 = vsyncpa [#allocation6], 0 }
   0x3   :  { %17 = vsyncpa [#allocation6 + $0x1], 0  ;;  %s1895_s21 = smov 0   ;;  %s1897_s22 = smov 0  }
   0x4   :  { %s1899_s23 = smov 0   ;;  %s1901_s24 = smov 0  }
   0x5   :  { %s1903_s25 = smov 0   ;;  %s1905_s26 = smov 0  }
   0x6 LB: > { %s1197_s27 = sadd.s32 4294967295, %s1853_s26   ;;  %s1198_s28 = sadd.s32 4294967294, %s1853_s26   ;;  %s1853_s26 = sphi %s1905_s26, %s23_s26   ;;  %s1849_s25 = sphi %s1903_s25, %s2302_s25   ;;  %s1845_s24 = sphi %s1901_s24, %s2301_s24   ;;  %s1841_s23 = sphi %s1899_s23, %s2300_s23   ;;  %s1837_s22 = sphi %s1897_s22, %s2299_s22   ;;  %s1833_s21 = sphi %s1895_s21, %s2298_s21  }
   0x7   : > { %s35_s29 = sadd.s32 1, %s1849_s25  ;;  %s175_s30 = sadd.s32 1, %s1841_s23 }
   0x8   : > { %p37_p0 = scmp.ge.s32.totalorder %s35_s29, 2  ;;  %p185_p1 = scmp.ne.s32.totalorder %s1841_s23, %s1837_s22 }
   0x9   : > { %p186_p2 = scmp.eq.s32.totalorder %s1197_s27, 1  ;;  %p191_p3 = scmp.ne.s32.totalorder %s1837_s22, %s1833_s21 }
   0xa   : > { %s2304_s29 = smov (%p37_p0, %s35_s29), 0  ;;  %p192_p5 = scmp.eq.s32.totalorder %s1198_s28, 1 }
   0xb   : > { %p1935_p4 = por %p186_p2, %p185_p1  ;;  %s172_s8 = ssub.s32 %s1849_s25, %s2304_s29 }
   0xc   : > { %p1201_p6 = scmp.ge.s32.totalorder %s1853_s26, 1  ;;  %p173_p7 = scmp.eq.s32.totalorder %s172_s8, 0 }
   0xd   : > { %p1942_p8 = por %p192_p5, %p191_p3  ;;  %p289_p9 = scmp.lt.s32.totalorder %s1853_s26, 3 }
   0xe   : > { %s1948_s10 = scalar_select %p173_p7, %s1841_s23, %s175_s30  }
   0xf   : > { %p290_p10 = pnand %p1201_p6, %p289_p9 }
  0x10   : > { %p354_p11 = scmp.lt.s32.totalorder (!%p290_p10), %s1845_s24, 1  ;;  %v597_v0 = vld [vmem:[%s2291_s4] sm:$0xff] (!%p290_p10)  ;;  %vm393_vm0 = vcmask (!%p290_p10), 261120   ;;  %v1855_v1 = vmov (!%p290_p10), 0.0   ;;  %v598_v2 = vld [vmem:[%s2291_s4 + $0x8] sm:$0xff] (!%p290_p10)  ;;  %v599_v3 = vld [vmem:[%s2291_s4 + $0x10] sm:$0xff] (!%p290_p10) }
  0x11   : > { %293 = sbr.rel (%p290_p10) target bundleno = 531 (0x213), region = 40  ;;  %601 = vxpose.xlu0.b32.start [1/4] (short) (narrow) (!%p290_p10), %v597_v0, 16  ;;  %395 = vst.msk [vmem:[#allocation2 + $0x8] sm:$0xff] (!%p290_p10), %vm393_vm0, %v1855_v1  ;;  %394 = vst.msk [vmem:[#allocation2] sm:$0xff] (!%p290_p10), %vm393_vm0, %v1855_v1  ;;  %v600_v20 = vld [vmem:[%s2291_s4 + $0x18] sm:$0xff] (!%p290_p10)  ;;  %s1268_s8 = sshll.u32 (!%p290_p10), %s1845_s24, 9 }
  0x12   : > { %396 = vst.msk [vmem:[#allocation2 + $0x10] sm:$0xff] (!%p290_p10), %vm393_vm0, %v1855_v1  ;;  %397 = vst.msk [vmem:[#allocation2 + $0x18] sm:$0xff] (!%p290_p10), %vm393_vm0, %v1855_v1  ;;  %s2194_s14 = scalar_lea.hbm (!%p290_p10), %s2293_s6, %s1268_s8 }
  0x13   : > { %vm2064_vm1 = vmpackc.low (!%p290_p10), %vm393_vm0, %vm393_vm0 }
  0x15   : > { %602 = vxpose.xlu0.b32.cont [2/4] (short) (narrow) (!%p290_p10), %v598_v2, 16 }
  0x18   : > { %s1959_s13 = scalar_select %p354_p11, %s1845_s24, 1  ;;  %v431_v60 = vld [vmem:[#allocation2 + $0x8] sm:$0xff]  ;;  %v430_v61 = vld [vmem:[#allocation2] sm:$0xff] }
  0x19   : > { %603 = vxpose.xlu0.b32.cont [3/4] (short) (narrow) %v599_v3, 16  ;;  %v515_v62 = vld [vmem:[#allocation2 + $0x18] sm:$0xff]  ;;  %v514_v0 = vld [vmem:[#allocation2 + $0x10] sm:$0xff] }
  0x1a   : > { %s1264_s16 = sshll.u32 %s1959_s13, 7  ;;  %s1266_s11 = sshll.u32 %s1959_s13, 4 }
  0x1b   : > { %s1968_s19 = scalar_lea.vmem %s2287_s0, %s1264_s16  ;;  %s1973_s28 = scalar_lea.vmem %s2288_s1, %s1264_s16 }
  0x1c   : > { %v398_v4 = vld [vmem:[%s1968_s19] sm:$0xff]  ;;  %v399_v5 = vld [vmem:[%s1968_s19 + $0x8] sm:$0xff]  ;;  %v400_v6 = vld [vmem:[%s1968_s19 + $0x10] sm:$0xff]  ;;  %s2017_s16 = scalar_lea.vmem %s2289_s2, %s1266_s11  ;;  %s2025_s20 = scalar_lea.vmem %s2290_s3, %s1266_s11 }
  0x1d   : > { %v1981_v7 = vpack.c.bf16 %v399_v5, %v398_v4  ;;  %v401_v8 = vld [vmem:[%s1968_s19 + $0x18] sm:$0xff]  ;;  %v414_v9 = vld [vmem:[%s1973_s28] sm:$0xff]  ;;  %v415_v10 = vld [vmem:[%s1973_s28 + $0x8] sm:$0xff]  ;;  %604 = vxpose.xlu0.b32.end [4/4] (short) (narrow) %v600_v20, 16 }
  0x1e   : > { %v1986_v11 = vpack.c.bf16 %v401_v8, %v400_v6  ;;  %v1988_v12 = vpack.c.bf16 %v415_v10, %v414_v9  ;;  %v402_v13 = vld [vmem:[%s1968_s19 + $0x20] sm:$0xff]  ;;  %v403_v14 = vld [vmem:[%s1968_s19 + $0x28] sm:$0xff]  ;;  %v416_v15 = vld [vmem:[%s1973_s28 + $0x10] sm:$0xff] }
  0x1f   : > { %1505 = vmatprep.subr.bf16.mxu0 %v1981_v7  ;;  %v417_v16 = vld [vmem:[%s1973_s28 + $0x18] sm:$0xff]  ;;  %v418_v18 = vld [vmem:[%s1973_s28 + $0x20] sm:$0xff]  ;;  %v419_v19 = vld [vmem:[%s1973_s28 + $0x28] sm:$0xff]  ;;  %v2006_v21 = vpack.c.bf16 %v403_v14, %v402_v13 }
  0x20   : > { %1507 = vmatpush3.bf16.msra.mxu0 %v1981_v7  ;;  %1537 = vmatprep.subr.bf16.mxu1 %v1988_v12  ;;  %v1998_v17 = vpack.c.bf16 %v417_v16, %v416_v15  ;;  %v404_v22 = vld [vmem:[%s1968_s19 + $0x30] sm:$0xff]  ;;  %v405_v23 = vld [vmem:[%s1968_s19 + $0x38] sm:$0xff]  ;;  %v2012_v24 = vpack.c.bf16 %v419_v19, %v418_v18  ;;  %v432_v28 = vld [vmem:[%s2017_s16] sm:$0xff] }
  0x21   : > { %1509 = vmatprep.subr.bf16.mxu0 %v1986_v11  ;;  %1539 = vmatpush3.bf16.msra.mxu1 %v1988_v12  ;;  %v420_v25 = vld [vmem:[%s1973_s28 + $0x30] sm:$0xff]  ;;  %v421_v26 = vld [vmem:[%s1973_s28 + $0x38] sm:$0xff]  ;;  %v2028_v27 = vpack.c.bf16 %v405_v23, %v404_v22  ;;  %v406_v29 = vld [vmem:[%s1968_s19 + $0x40] sm:$0xff] }
  0x22   : > { %1541 = vmatprep.subr.bf16.mxu1 %v1998_v17  ;;  %v407_v30 = vld [vmem:[%s1968_s19 + $0x48] sm:$0xff]  ;;  %v2035_v31 = vpack.c.bf16 %v421_v26, %v420_v25  ;;  %1382 = vmatprep.mubr.f32.mxu0 %v432_v28  ;;  %v422_v32 = vld [vmem:[%s1973_s28 + $0x40] sm:$0xff]  ;;  %v408_v36 = vld [vmem:[%s1968_s19 + $0x50] sm:$0xff] }
  0x23   : > { %v423_v33 = vld [vmem:[%s1973_s28 + $0x48] sm:$0xff]  ;;  %v516_v34 = vld [vmem:[%s2025_s20] sm:$0xff]  ;;  %v2042_v35 = vpack.c.bf16 %v407_v30, %v406_v29  ;;  %v409_v37 = vld [vmem:[%s1968_s19 + $0x58] sm:$0xff] }
  0x24   : > { %1511 = vmatpush3.bf16.msra.mxu0 %v1986_v11  ;;  %1417 = vmatprep.mubr.f32.mxu1 %v516_v34  ;;  %v1552_v38 = vpack.c.bf16 %v423_v33, %v422_v32  ;;  %v424_v39 = vld [vmem:[%s1973_s28 + $0x50] sm:$0xff]  ;;  %v425_v40 = vld [vmem:[%s1973_s28 + $0x58] sm:$0xff]  ;;  %v1524_v41 = vpack.c.bf16 %v409_v37, %v408_v36  ;;  %v410_v42 = vld [vmem:[%s1968_s19 + $0x60] sm:$0xff] }
  0x25   : > { %1513 = vmatprep.subr.bf16.mxu0 %v2006_v21  ;;  %1543 = vmatpush3.bf16.msra.mxu1 %v1998_v17  ;;  %v411_v43 = vld [vmem:[%s1968_s19 + $0x68] sm:$0xff]  ;;  %v1556_v44 = vpack.c.bf16 %v425_v40, %v424_v39  ;;  %v426_v45 = vld [vmem:[%s1973_s28 + $0x60] sm:$0xff]  ;;  %v412_v48 = vld [vmem:[%s1968_s19 + $0x70] sm:$0xff] }
  0x26   : > { %1545 = vmatprep.subr.bf16.mxu1 %v2012_v24  ;;  %v427_v46 = vld [vmem:[%s1973_s28 + $0x68] sm:$0xff]  ;;  %v1528_v47 = vpack.c.bf16 %v411_v43, %v410_v42  ;;  %v413_v49 = vld [vmem:[%s1968_s19 + $0x78] sm:$0xff]  ;;  %v428_v51 = vld [vmem:[%s1973_s28 + $0x70] sm:$0xff]  ;;  %s2181_s19 = sand.u32 1, %s1837_s22  }
  0x27   : > { %v1560_v50 = vpack.c.bf16 %v427_v46, %v426_v45  ;;  %v429_v52 = vld [vmem:[%s1973_s28 + $0x78] sm:$0xff]  ;;  %v1532_v53 = vpack.c.bf16 %v413_v49, %v412_v48  ;;  %v433_v56 = vld [vmem:[%s2017_s16 + $0x8] sm:$0xff]  ;;  %s1202_s27 = sshll.u32 %s2181_s19, 5  ;;  %s1003_s13 = scalar_lea.sflag [#allocation6], %s2181_s19 }
  0x28   : > { %1515 = vmatpush3.bf16.msra.mxu0 %v2006_v21  ;;  %v1564_v54 = vpack.c.bf16 %v429_v52, %v428_v51  ;;  %v517_v57 = vld [vmem:[%s2025_s20 + $0x8] sm:$0xff]  ;;  %s352_s28 = scalar_lea.vmem [#allocation5], %s1202_s27  ;;  %s1856_s16 = smov [#allocation5]  }
  0x29   : > { %1517 = vmatprep.subr.bf16.mxu0 %v2028_v27  ;;  %1547 = vmatpush3.bf16.msra.mxu1 %v2012_v24  ;;  %s1033_s30 = sshll.u32 %s352_s28, 4  ;;  %s1747_s17 = sshll.u32 %s1856_s16, 4  ;;  %s2187_s30 = int_to_ptr.vmem [resolvable:$true] %s1033_s30  ;;  %s1748_s17 = int_to_ptr.vmem [resolvable:$false] %s1747_s17 }
  0x2a   : > { %1549 = vmatprep.subr.bf16.mxu1 %v2035_v31  ;;  %s1743_s15 = scalar_lea.vmem %s2187_s30, 512  ;;  %s1749_s18 = scalar_lea.vmem %s1748_s17, 1024 }
  0x2b   : > { %p1744_p12 = scmp.ne.s32.totalorder %s2187_s30, %s1743_s15  ;;  %p1750_p1 = scmp.lt.s32.totalorder %s2187_s30, %s1748_s17 }
  0x2c   : > { %1519 = vmatpush3.bf16.msra.mxu0 %v2028_v27  ;;  %p1751_p2 = scmp.lt.s32.totalorder %s1749_s18, %s1743_s15 }
  0x2d   : > { %1521 = vmatprep.subr.bf16.mxu0 %v2042_v35  ;;  %1551 = vmatpush3.bf16.msra.mxu1 %v2035_v31  ;;  %p1745_p13 = pnand %p1744_p12, %p1935_p4 }
  0x2e   : > { %1553 = vmatprep.subr.bf16.mxu1 %v1552_v38  ;;  %p1752_p3 = por %p1751_p2, %p1750_p1 }
  0x2f   : > { %p1746_p0 = pneg %p1745_p13 }
  0x30   : > { %1523 = vmatpush3.bf16.msra.mxu0 %v2042_v35 }
  0x31   : > { %1525 = vmatprep.subr.bf16.mxu0 %v1524_v41  ;;  %1555 = vmatpush3.bf16.msra.mxu1 %v1552_v38  ;;  %p1753_p5 = pnand %p1752_p3, %p1746_p0 }
  0x32   : > { %1557 = vmatprep.subr.bf16.mxu1 %v1556_v44 }
  0x34   : > { %1527 = vmatpush3.bf16.msra.mxu0 %v1524_v41 }
  0x35   : > { %1529 = vmatprep.subr.bf16.mxu0 %v1528_v47  ;;  %1559 = vmatpush3.bf16.msra.mxu1 %v1556_v44 }
  0x36   : > { %1561 = vmatprep.subr.bf16.mxu1 %v1560_v50 }
  0x38   : > { %1531 = vmatpush3.bf16.msra.mxu0 %v1528_v47 }
  0x39   : > { %1533 = vmatprep.subr.bf16.mxu0 %v1532_v53  ;;  %1563 = vmatpush3.bf16.msra.mxu1 %v1560_v50 }
  0x3a   : > { %1565 = vmatprep.subr.bf16.mxu1 %v1564_v54 }
  0x3c   : > { %1535 = vmatpush3.bf16.msra.mxu0 %v1532_v53 }
  0x3d   : > { %1567 = vmatpush3.bf16.msra.mxu1 %v1564_v54  ;;  %1570 = vmatprep.subr.msk.bf16.mxu0 %vm2064_vm1, %v1981_v7 }
  0x3e   : > { %1618 = vmatprep.subr.msk.bf16.mxu1 %vm2064_vm1, %v1988_v12 }
  0x3f   : > { %1383 = vmatmul.mubr.f32.vlgmr.msra.gmra.mrb[0].mxu0 %v433_v56 }
  0x40   : > { %1418 = vmatmul.mubr.f32.vlgmr.msra.gmra.mrb[0].mxu1 %v517_v57 }
  0x45   : > { %1573 = vmatpush3.bf16.xpose.msk.msra.mxu0 %vm2064_vm1, %v1981_v7 }
  0x46   : > { %1621 = vmatpush3.bf16.xpose.msk.msra.mxu1 %vm2064_vm1, %v1988_v12  ;;  %1576 = vmatprep.subr.msk.bf16.mxu0 %vm2064_vm1, %v1986_v11 }
  0x47   : > { %1624 = vmatprep.subr.msk.bf16.mxu1 %vm2064_vm1, %v1998_v17 }
  0x4d   : > { %1579 = vmatpush3.bf16.xpose.msk.msra.mxu0 %vm2064_vm1, %v1986_v11 }
  0x4e   : > { %1627 = vmatpush3.bf16.xpose.msk.msra.mxu1 %vm2064_vm1, %v1998_v17  ;;  %1582 = vmatprep.subr.msk.bf16.mxu0 %vm2064_vm1, %v2006_v21 }
  0x4f   : > { %1630 = vmatprep.subr.msk.bf16.mxu1 %vm2064_vm1, %v2012_v24 }
  0x55   : > { %1585 = vmatpush3.bf16.xpose.msk.msra.mxu0 %vm2064_vm1, %v2006_v21 }
  0x56   : > { %1633 = vmatpush3.bf16.xpose.msk.msra.mxu1 %vm2064_vm1, %v2012_v24  ;;  %1588 = vmatprep.subr.msk.bf16.mxu0 %vm2064_vm1, %v2028_v27 }
  0x57   : > { %1636 = vmatprep.subr.msk.bf16.mxu1 %vm2064_vm1, %v2035_v31 }
  0x5d   : > { %1591 = vmatpush3.bf16.xpose.msk.msra.mxu0 %vm2064_vm1, %v2028_v27 }
  0x5e   : > { %1639 = vmatpush3.bf16.xpose.msk.msra.mxu1 %vm2064_vm1, %v2035_v31  ;;  %1594 = vmatprep.subr.msk.bf16.mxu0 %vm2064_vm1, %v2042_v35 }
  0x5f   : > { %1642 = vmatprep.subr.msk.bf16.mxu1 %vm2064_vm1, %v1552_v38 }
  0x65   : > { %1597 = vmatpush3.bf16.xpose.msk.msra.mxu0 %vm2064_vm1, %v2042_v35 }
  0x66   : > { %1645 = vmatpush3.bf16.xpose.msk.msra.mxu1 %vm2064_vm1, %v1552_v38  ;;  %1600 = vmatprep.subr.msk.bf16.mxu0 %vm2064_vm1, %v1524_v41 }
  0x67   : > { %1648 = vmatprep.subr.msk.bf16.mxu1 %vm2064_vm1, %v1556_v44 }
  0x6d   : > { %1603 = vmatpush3.bf16.xpose.msk.msra.mxu0 %vm2064_vm1, %v1524_v41 }
  0x6e   : > { %1651 = vmatpush3.bf16.xpose.msk.msra.mxu1 %vm2064_vm1, %v1556_v44  ;;  %1606 = vmatprep.subr.msk.bf16.mxu0 %vm2064_vm1, %v1528_v47 }
  0x6f   : > { %1654 = vmatprep.subr.msk.bf16.mxu1 %vm2064_vm1, %v1560_v50 }
  0x75   : > { %1609 = vmatpush3.bf16.xpose.msk.msra.mxu0 %vm2064_vm1, %v1528_v47 }
  0x76   : > { %1657 = vmatpush3.bf16.xpose.msk.msra.mxu1 %vm2064_vm1, %v1560_v50  ;;  %1612 = vmatprep.subr.msk.bf16.mxu0 %vm2064_vm1, %v1532_v53 }
  0x77   : > { %1660 = vmatprep.subr.msk.bf16.mxu1 %vm2064_vm1, %v1564_v54 }
  0x7d   : > { %1615 = vmatpush3.bf16.xpose.msk.msra.mxu0 %vm2064_vm1, %v1532_v53 }
  0x7e   : > { %1663 = vmatpush3.bf16.xpose.msk.msra.mxu1 %vm2064_vm1, %v1564_v54 }
  0x91   : > { %v617_v58 = vpop.trf.xlu0 }
  0x92   : > { %1452 = vmatprep.mubr.msk.f32.mxu0 %vm393_vm0, %v617_v58  ;;  %1487 = vmatprep.mubr.msk.f32.mxu1 %vm393_vm0, %v617_v58 }
  0x95   : > { %v618_v59 = vpop.trf.xlu0 }
  0x96   : > { %1453 = vmatmul.mubr.msk.f32.vlgmr.msra.gmra.mrb[2].mxu0 %vm393_vm0, %v618_v59  ;;  %1488 = vmatmul.mubr.msk.f32.vlgmr.msra.gmra.mrb[2].mxu1 %vm393_vm0, %v618_v59 }
 0x112   : > { %v1384_v63 = vpop.f32.mrb[0].mxu0 }
 0x113   : > { %v510_v1 = vadd.f32 %v1384_v63, %v431_v60  ;;  %v500_v2 = vpop.f32.mrb[1].mxu0  ;;  %v1419_v3 = vpop.f32.mrb[0].mxu1 }
 0x114   : > { %v509_v4 = vadd.f32 %v500_v2, %v430_v61  ;;  %v594_v5 = vadd.f32 %v1419_v3, %v515_v62  ;;  %v584_v6 = vpop.f32.mrb[1].mxu1 }
 0x115   : > { %513 = vst.msk [vmem:[#allocation2 + $0x8] sm:$0xff] %vm393_vm0, %v510_v1  ;;  %v593_v7 = vadd.f32 %v584_v6, %v514_v0 }
 0x116   : > { %512 = vst.msk [vmem:[#allocation2] sm:$0xff] %vm393_vm0, %v509_v4  ;;  %596 = vst.msk [vmem:[#allocation2 + $0x18] sm:$0xff] %vm393_vm0, %v594_v5 }
 0x117   : > { %595 = vst.msk [vmem:[#allocation2 + $0x10] sm:$0xff] %vm393_vm0, %v593_v7 }
 0x11c   : > { %v893_v8 = vld [vmem:[#allocation2 + $0x8] sm:$0xff] }
 0x11d   : > { %v892_v9 = vld [vmem:[#allocation2] sm:$0xff]  ;;  %v895_v10 = vld [vmem:[#allocation2 + $0x18] sm:$0xff] }
 0x11e   : > { %v1664_v11 = vpack.c.bf16 %v893_v8, %v892_v9  ;;  %1498 = vmatprep.mubr.msk.f32.mxu0 %vm393_vm0, %v892_v9  ;;  %v894_v12 = vld [vmem:[#allocation2 + $0x10] sm:$0xff] }
 0x11f   : > { %v1670_v13 = vpack.c.bf16 %v895_v10, %v894_v12  ;;  %1501 = vmatprep.mubr.msk.f32.mxu1 %vm393_vm0, %v894_v12 }
 0x120   : > { %1666 = vmatprep.subr.msk.bf16.mxu0 %vm2064_vm1, %v1664_v11  ;;  %1676 = vmatprep.subr.msk.bf16.mxu1 %vm2064_vm1, %v1664_v11 }
 0x121   : > { %1669 = vmatpush3.bf16.xpose.msk.msra.mxu0 %vm2064_vm1, %v1664_v11  ;;  %1678 = vmatpush3.bf16.xpose.msk.msra.mxu1 %vm2064_vm1, %v1664_v11 }
 0x122   : > { %1672 = vmatprep.subr.msk.bf16.mxu0 %vm2064_vm1, %v1670_v13  ;;  %1677 = vmatprep.subr.msk.bf16.mxu1 %vm2064_vm1, %v1670_v13 }
 0x129   : > { %1675 = vmatpush3.bf16.xpose.msk.msra.mxu0 %vm2064_vm1, %v1670_v13  ;;  %1679 = vmatpush3.bf16.xpose.msk.msra.mxu1 %vm2064_vm1, %v1670_v13 }
 0x130   : > { %1499 = vmatmul.mubr.msk.f32.vlgmr.msra.gmra.mrb[4].mxu0 %vm393_vm0, %v893_v8  ;;  %1502 = vmatmul.mubr.msk.f32.vlgmr.msra.gmra.mrb[4].mxu1 %vm393_vm0, %v895_v10 }
 0x169   : > { %v1454_v14 = vpop.f32.mrb[2].mxu0  ;;  %v1489_v15 = vpop.f32.mrb[2].mxu1 }
 0x16a   : > { %763 = vst [vmem:[%s352_s28 + $0x8] sm:$0xff] %v1454_v14  ;;  %888 = vst [vmem:[%s352_s28 + $0x18] sm:$0xff] %v1489_v15  ;;  %v753_v16 = vpop.f32.mrb[3].mxu0  ;;  %v878_v17 = vpop.f32.mrb[3].mxu1 }
 0x16b   : > { %762 = vst [vmem:[%s352_s28] sm:$0xff] %v753_v16  ;;  %887 = vst [vmem:[%s352_s28 + $0x10] sm:$0xff] %v878_v17 }
 0x16c   : > { %1756 = shalt.err (!%p1753_p5)
}
 0x16d   : > { %s1757_s20 = scalar_lea.hbm %s2194_s14, 512  ;;  %s1761_s12 = scalar_lea.hbm %s2293_s6, 1024 }
 0x16e   : > { %p1758_p6 = scmp.ne.s32.totalorder %s2194_s14, %s1757_s20  ;;  %p1762_p10 = scmp.lt.u32.totalorder %s2194_s14, %s2293_s6 }
 0x16f   : > { %p1763_p11 = scmp.lt.u32.totalorder %s1761_s12, %s1757_s20  ;;  %p1765_p13 = scmp.lt.u32.totalorder %s1757_s20, %s2194_s14 }
 0x170   : > { %p1759_p7 = pnand %p1758_p6, %p1935_p4 }
 0x171   : > { %p1764_p12 = por %p1763_p11, %p1762_p10 }
 0x172   : > { %p1760_p9 = pneg %p1759_p7 }
 0x173   : > { %p1766_p0 = por %p1765_p13, %p1764_p12 }
 0x175   : > { %p1767_p1 = pnand %p1766_p0, %p1760_p9 }
 0x177   : > { %1770 = shalt.err (!%p1767_p1)
}
 0x178   : > { %s1857_s15 = smov 128   ;;  %s1858_s18 = smov 8  }
 0x179   : > { %1681 = dma.vmem_to_hbm [thread:$0]  (%p1935_p4), %s2187_s30, 512, %s2194_s14, %s1003_s13, %s1857_s15, %s1857_s15, %s1858_s18  }
 0x17a   : > { %s345_s20 = scalar_lea.vmem [#allocation3], %s1202_s27  ;;  %s2232_s16 = scalar_lea.hbm %s2292_s5, %s1268_s8 }
 0x17b   : > { %s1016_s28 = sshll.u32 %s345_s20, 4  ;;  %s998_s27 = scalar_lea.sflag [#allocation4], %s2181_s19  ;;  %s2225_s28 = int_to_ptr.vmem [resolvable:$true] %s1016_s28 }
 0x17c   : > { %s1771_s30 = scalar_lea.vmem %s2225_s28, 512  ;;  %s1859_s24 = smov [#allocation3]  }
 0x17d   : > { %p1772_p2 = scmp.ne.s32.totalorder %s2225_s28, %s1771_s30  ;;  %s1775_s8 = sshll.u32 %s1859_s24, 4  ;;  %s1776_s8 = int_to_ptr.vmem [resolvable:$false] %s1775_s8 }
 0x17e   : > { %s1777_s14 = scalar_lea.vmem %s1776_s8, 1024  ;;  %p1778_p6 = scmp.lt.s32.totalorder %s2225_s28, %s1776_s8 }
 0x17f   : > { %p1773_p3 = pnand %p1772_p2, %p1935_p4  ;;  %p1779_p7 = scmp.lt.s32.totalorder %s1777_s14, %s1771_s30 }
 0x181   : > { %p1774_p5 = pneg %p1773_p3  ;;  %p1780_p9 = por %p1779_p7, %p1778_p6 }
 0x183   : > { %p1781_p10 = pnand %p1780_p9, %p1774_p5 }
 0x203   : > { %v1500_v18 = vpop.f32.mrb[4].mxu0  ;;  %v1503_v19 = vpop.f32.mrb[4].mxu1 }
 0x204   : > { %994 = vst.msk [vmem:[%s345_s20 + $0x8] sm:$0xff] %vm393_vm0, %v1500_v18  ;;  %996 = vst.msk [vmem:[%s345_s20 + $0x18] sm:$0xff] %vm393_vm0, %v1503_v19  ;;  %v974_v20 = vpop.f32.mrb[5].mxu0  ;;  %v984_v21 = vpop.f32.mrb[5].mxu1 }
 0x205   : > { %993 = vst.msk [vmem:[%s345_s20] sm:$0xff] %vm393_vm0, %v974_v20  ;;  %995 = vst.msk [vmem:[%s345_s20 + $0x10] sm:$0xff] %vm393_vm0, %v984_v21 }
 0x206   : > { %1784 = shalt.err (!%p1781_p10)
}
 0x207   : > { %s1785_s13 = scalar_lea.hbm %s2232_s16, 512  ;;  %s1789_s11 = scalar_lea.hbm %s2292_s5, 1024 }
 0x208   : > { %p1786_p11 = scmp.ne.s32.totalorder %s2232_s16, %s1785_s13  ;;  %p1790_p0 = scmp.lt.u32.totalorder %s2232_s16, %s2292_s5 }
 0x209   : > { %p1791_p1 = scmp.lt.u32.totalorder %s1789_s11, %s1785_s13  ;;  %p1793_p3 = scmp.lt.u32.totalorder %s1785_s13, %s2232_s16 }
 0x20a   : > { %p1787_p12 = pnand %p1786_p11, %p1935_p4 }
 0x20b   : > { %p1792_p2 = por %p1791_p1, %p1790_p0 }
 0x20c   : > { %p1788_p13 = pneg %p1787_p12 }
 0x20d   : > { %p1794_p5 = por %p1793_p3, %p1792_p2 }
 0x20f   : > { %p1795_p6 = pnand %p1794_p5, %p1788_p13 }
 0x211   : > { %1798 = shalt.err (!%p1795_p6)
}
 0x212   : > { %1680 = dma.vmem_to_hbm [thread:$0]  (%p1935_p4), %s2225_s28, 512, %s2232_s16, %s998_s27, %s1857_s15, %s1857_s15, %s1858_s18  }
 0x213 PF: > { %p1691_p7 = scmp.ge.s32.totalorder %s1853_s26, 2  ;;  %s1048_s30 = sand.u32 1, %s1833_s21  }
 0x214   : > { %s1049_s8 = scalar_lea.sflag [#allocation4], %s1048_s30 }
 0x215   : > { %p1685_p9 = pnand %p1691_p7, %p1942_p8 }
 0x217   : > { %1824 = dma.done.wait (!%p1685_p9), %s1049_s8, 512  }
 0x218   : > { %1826 = vsyncadd (!%p1685_p9), %s1049_s8, 4294966784  ;;  %s1058_s7 = scalar_lea.sflag [#allocation6], %s1048_s30 }
 0x219   : > { %1828 = dma.done.wait (!%p1685_p9), %s1058_s7, 512  }
 0x21a   : > { %1830 = vsyncadd (!%p1685_p9), %s1058_s7, 4294966784  ;;  %s23_s26 = sadd.s32 1, %s1853_s26   ;;  %s2298_s21 = smov %s1837_s22 }
 0x21b   : > { %p20_p10 = scmp.ge.s32.totalorder %s23_s26, 4   ;;  %s2299_s22 = smov %s1841_s23 }
 0x21c   : > { %s2300_s23 = smov %s1948_s10  ;;  %s2301_s24 = smov %s1849_s25 }
 0x21d   : > { %s2302_s25 = smov %s2304_s29  ;;  %22 = sbr.rel (!%p20_p10) target bundleno = 6 (0x6), region = 109 }
 0x224   :  { %1063 = vsyncpa [#allocation4], 1 }
 0x225   :  { %1065 = vsyncpa [#allocation4 + $0x1], 1 }
 0x226   :  { %1066 = vsyncpa [#allocation6], 1 }
 0x227   :  { %1068 = vsyncpa [#allocation6 + $0x1], 1 }

</bundles_post_ra>
